<compile_context>
chip_gen: v5e
topology: v5e:2x2
jax: 0.10.0
libtpu: 0.0.40
codegen_flags: <defaults>
</compile_context>

<pallas_src>
import functools

import jax
import jax.numpy as jnp
from jax.experimental import pallas as pl
from jax.experimental.pallas import tpu as pltpu


def _round_up(x, m):
    return ((x + m - 1) // m) * m


def _pick_tk(kp):
    """Largest multiple of 128 that divides kp (kp is a multiple of 128), <= 1024."""
    for t in range(1024, 127, -128):
        if kp % t == 0:
            return t
    return 128


def _pick_tm(n, tk, cp, x_itemsize, w_itemsize, budget=24 << 20):
    """Row tile: multiple of 8, VMEM-budgeted, >= 2 row tiles when N > 8."""
    # W^T tile + bias (conservatively counted double-buffered).
    fixed = 2 * tk * cp * w_itemsize + 2 * cp * 4
    # Per-row live bytes: double-buffered x tile + double-buffered f32 out tile.
    per_row = 2 * tk * x_itemsize + 2 * cp * 4
    avail = max(budget - fixed, 2 << 20)
    cap = max(8, min(1024, (avail // per_row) // 8 * 8))
    if n <= 8:
        return 8
    # At least two row tiles so the "parallel" axis shards across both v7x TCs.
    tm = _round_up((n + 1) // 2, 8)
    return max(8, min(tm, cap))


def _logreg_kernel(x_ref, w_ref, b_ref, o_ref):
    """Grid = (row_tiles, k_tiles); K last; accumulate directly into o_ref (f32)."""
    @pl.when(pl.program_id(1) == 0)
    def _():
        # Initialize the resident output block with the bias (added exactly once).
        o_ref[...] = jnp.broadcast_to(b_ref[...], o_ref.shape).astype(o_ref.dtype)

    # Cast the x tile to the weight compute dtype (no-op when both are f32);
    # accumulation stays f32 via preferred_element_type.
    o_ref[...] += jnp.dot(
        x_ref[...].astype(w_ref.dtype), w_ref[...],
        preferred_element_type=jnp.float32)


@functools.partial(jax.jit, static_argnames=("nb_classes", "kp", "tk"))
def logreg_forward(x, w_t, b2, *, nb_classes, kp, tk):
    """x: (N, F); w_t: (kp, cp) pre-transposed (+K-padded only for tiled path);
    b2: (1, cp) f32. Returns (N, nb_classes) f32."""
    n, f = x.shape
    cp = w_t.shape[1]

    # K padding only for the K-tiled fallback when F is not 128-aligned
    # (keeps the K tail exact — OOB K reads could be NaN garbage otherwise).
    # Rows are never padded: the last row block is partial and masked by Pallas.
    if f != kp:
        x = jnp.pad(x, ((0, 0), (0, kp - f)))

    tm = _pick_tm(n, tk, cp, x.dtype.itemsize, w_t.dtype.itemsize)
    grid = (pl.cdiv(n, tm), kp // tk)

    out = pl.pallas_call(
        _logreg_kernel,
        out_shape=jax.ShapeDtypeStruct((n, cp), jnp.float32),
        grid_spec=pltpu.PrefetchScalarGridSpec(
            num_scalar_prefetch=0,
            grid=grid,
            in_specs=[
                pl.BlockSpec((tm, tk), lambda i, k: (i, k)),   # x row/K tile
                pl.BlockSpec((tk, cp), lambda i, k: (k, 0)),   # W^T (resident if kp==tk)
                pl.BlockSpec((1, cp), lambda i, k: (0, 0)),    # bias, resident
            ],
            out_specs=pl.BlockSpec((tm, cp), lambda i, k: (i, 0)),
        ),
        compiler_params=pltpu.CompilerParams(
            dimension_semantics=("parallel", "arbitrary"),
            vmem_limit_bytes=48 << 20),
        cost_estimate=pl.CostEstimate(
            flops=2 * n * kp * cp,
            transcendentals=0,
            bytes_accessed=x.dtype.itemsize * n * kp
            + w_t.dtype.itemsize * kp * cp + 4 * n * cp),
    )(x, w_t, b2)

    # Class-lane slice only (rows are exact). Fuse the consumer onto the padded
    # (N, cp) layout to avoid this copy entirely when possible.
    return out[:, :nb_classes]


def xavier_uniform(key, shape, dtype=jnp.float32):
    # torch.nn.init.xavier_uniform_ (gain=1): U(-a, a), a = sqrt(6/(fan_in+fan_out))
    fan_out, fan_in = shape  # nn.Linear weight layout is (out_features, in_features)
    a = (6.0 / (fan_in + fan_out)) ** 0.5
    return jax.random.uniform(key, shape, dtype=dtype, minval=-a, maxval=a)


class LogReg:
    """JAX/Pallas equivalent of the PyTorch LogReg module's forward pass."""

    def __init__(self, ft_in, nb_classes, key, dtype=jnp.float32,
                 compute_dtype=None):
        self.ft_in = ft_in
        self.nb_classes = nb_classes

        weight = xavier_uniform(key, (nb_classes, ft_in), dtype)   # (C, F)
        bias = jnp.zeros((nb_classes,), dtype)                     # fill_(0.0)
        self.weight = weight
        self.bias = bias

        # --- one-time layout prep (NOT per call) ---
        cdt = dtype if compute_dtype is None else compute_dtype
        cp = _round_up(max(nb_classes, 1), 128)                    # lane-dense classes
        itemsize = jnp.dtype(cdt).itemsize
        kp_aligned = _round_up(max(ft_in, 1), 128)
        if 2 * kp_aligned * cp * itemsize <= (8 << 20):
            # W^T fully VMEM-resident: single K step, no K padding of x or W.
            kp, tk = ft_in, ft_in
        else:
            # Large-F fallback: K-tiled accumulation, tk divides round_up(F, 128).
            kp, tk = kp_aligned, _pick_tk(kp_aligned)
        self._cp, self._kp, self._tk = cp, kp, tk
        self._compute_dtype = cdt

        w_t = jnp.zeros((kp, cp), cdt).at[:ft_in, :nb_classes].set(
            weight.T.astype(cdt))
        b2 = jnp.zeros((1, cp), jnp.float32).at[0, :nb_classes].set(
            bias.astype(jnp.float32))
        self.w_t = w_t
        self.b2 = b2
        # TODO(synk): optional fp8 weights/activations on v7x (fp8 MXU) would
        # halve x HBM bytes again vs bf16, gated on accuracy.

    def __call__(self, seq):
        # nn.Linear supports arbitrary leading dims; flatten them for the kernel.
        lead = seq.shape[:-1]
        x2d = seq.reshape(-1, seq.shape[-1])
        out = logreg_forward(x2d, self.w_t, self.b2,
                             nb_classes=self.nb_classes,
                             kp=self._kp, tk=self._tk)
        return out.reshape(*lead, self.nb_classes)


if __name__ == "__main__":
    key = jax.random.PRNGKey(0)
    k_w1, k_x1, k_w2, k_x2 = jax.random.split(key, 4)

    # --- small shapes matching the module (seq = (batch, ft_in)) ---
    N, ft_in, nb_classes = 8, 32, 16
    model = LogReg(ft_in, nb_classes, k_w1)
    x = jax.random.normal(k_x1, (N, ft_in), dtype=jnp.float32)

    out = model(x)
    jax.block_until_ready(out)

    ref = x @ model.weight.T + model.bias
    assert out.shape == (N, nb_classes)
    assert jnp.allclose(out, ref, atol=1e-5, rtol=1e-5)

    # --- second check: partial last row tile + two row tiles (megacore path) ---
    N2, ft_in2, nb_classes2 = 600, 640, 10
    model2 = LogReg(ft_in2, nb_classes2, k_w2)
    x2 = jax.random.normal(k_x2, (N2, ft_in2), dtype=jnp.float32)

    out2 = model2(x2)
    jax.block_until_ready(out2)

    ref2 = x2 @ model2.weight.T + model2.bias
    assert out2.shape == (N2, nb_classes2)
    assert jnp.allclose(out2, ref2, atol=1e-4, rtol=1e-5)

    # --- optional bf16 compute path (same weights; f32 accumulation) ---
    model3 = LogReg(ft_in2, nb_classes2, k_w2, compute_dtype=jnp.bfloat16)
    out3 = model3(x2.astype(jnp.bfloat16))
    jax.block_until_ready(out3)
    assert out3.shape == (N2, nb_classes2)
    assert bool(jnp.all(jnp.isfinite(out3)))
    assert jnp.allclose(out3, ref2, atol=0.5, rtol=0.05)

    print("KERNEL_OK")
</pallas_src>

<mosaic_0001>
module attributes {stable_mosaic.version = 11 : i64} {
  func.func @_logreg_kernel(%arg0: i32, %arg1: i32, %arg2: memref<8x32xf32, #tpu.memory_space<vmem>>, %arg3: memref<32x128xf32, #tpu.memory_space<vmem>>, %arg4: memref<1x128xf32, #tpu.memory_space<vmem>>, %arg5: memref<8x128xf32, #tpu.memory_space<vmem>>) attributes {dimension_semantics = [#tpu.dimension_semantics<parallel>, #tpu.dimension_semantics<arbitrary>], iteration_bounds = array<i64: 1, 1>, scalar_prefetch = 0 : i64, scratch_operands = 0 : i64, tpu.core_type = #tpu.core_type<tc>, window_params = [{transform_indices = @transform_0, window_bounds = array<i64: 8, 32>}, {transform_indices = @transform_1, window_bounds = array<i64: 32, 128>}, {pipeline_mode = #tpu.pipeline_mode<synchronous>, transform_indices = @transform_2, window_bounds = array<i64: 1, 128>}, {transform_indices = @transform_3, window_bounds = array<i64: 8, 128>}]} {
    %c0_i32 = arith.constant 0 : i32
    %0 = arith.cmpi eq, %arg1, %c0_i32 : i32
    %1 = arith.extui %0 : i1 to i32
    %c0_i32_0 = arith.constant 0 : i32
    %2 = arith.cmpi ne, %1, %c0_i32_0 : i32
    scf.if %2 {
      %c0_8 = arith.constant 0 : index
      %c0_9 = arith.constant 0 : index
      %9 = vector.load %arg4[%c0_8, %c0_9] : memref<1x128xf32, #tpu.memory_space<vmem>>, vector<1x128xf32>
      %10 = vector.shape_cast %9 : vector<1x128xf32> to vector<1x128xf32>
      %11 = vector.broadcast %10 : vector<1x128xf32> to vector<8x128xf32>
      %c0_10 = arith.constant 0 : index
      %c0_11 = arith.constant 0 : index
      %12 = vector.load %arg5[%c0_10, %c0_11] : memref<8x128xf32, #tpu.memory_space<vmem>>, vector<8x128xf32>
      tpu.vector_store %arg5[%c0_10, %c0_11], %11 {strides = array<i32>} : memref<8x128xf32, #tpu.memory_space<vmem>>, vector<8x128xf32>,
    } else {
    }
    %c0 = arith.constant 0 : index
    %c0_1 = arith.constant 0 : index
    %3 = vector.load %arg5[%c0, %c0_1] : memref<8x128xf32, #tpu.memory_space<vmem>>, vector<8x128xf32>
    %c0_2 = arith.constant 0 : index
    %c0_3 = arith.constant 0 : index
    %4 = vector.load %arg2[%c0_2, %c0_3] : memref<8x32xf32, #tpu.memory_space<vmem>>, vector<8x32xf32>
    %c0_4 = arith.constant 0 : index
    %c0_5 = arith.constant 0 : index
    %5 = vector.load %arg3[%c0_4, %c0_5] : memref<32x128xf32, #tpu.memory_space<vmem>>, vector<32x128xf32>
    %cst = arith.constant dense<0.000000e+00> : vector<8x128xf32>
    %6 = tpu.matmul %4, %5, %cst {dimension_numbers = #tpu.dot_dimension_numbers<[1], [0], [0], [1], [0, 0, 1, 1], [], []>} : vector<8x32xf32>, vector<32x128xf32>, vector<8x128xf32> -> vector<8x128xf32>
    %7 = arith.addf %3, %6 : vector<8x128xf32>
    %c0_6 = arith.constant 0 : index
    %c0_7 = arith.constant 0 : index
    %8 = vector.load %arg5[%c0_6, %c0_7] : memref<8x128xf32, #tpu.memory_space<vmem>>, vector<8x128xf32>
    tpu.vector_store %arg5[%c0_6, %c0_7], %7 {strides = array<i32>} : memref<8x128xf32, #tpu.memory_space<vmem>>, vector<8x128xf32>,
    return
  }
  func.func @transform_0(%arg0: i32, %arg1: i32) -> (i32, i32) {
    %c0_i32 = arith.constant 0 : i32
    return %arg0, %arg1 : i32, i32
  }
  func.func @transform_1(%arg0: i32, %arg1: i32) -> (i32, i32) {
    %c0_i32 = arith.constant 0 : i32
    %c0_i32_0 = arith.constant 0 : i32
    return %arg1, %c0_i32 : i32, i32
  }
  func.func @transform_2(%arg0: i32, %arg1: i32) -> (i32, i32) {
    %c0_i32 = arith.constant 0 : i32
    %c0_i32_0 = arith.constant 0 : i32
    %c0_i32_1 = arith.constant 0 : i32
    return %c0_i32, %c0_i32_0 : i32, i32
  }
  func.func @transform_3(%arg0: i32, %arg1: i32) -> (i32, i32) {
    %c0_i32 = arith.constant 0 : i32
    %c0_i32_0 = arith.constant 0 : i32
    return %arg0, %c0_i32 : i32, i32
  }
}

</mosaic_0001>

<bundles_post_ra>
// kernel: logreg_forward.1
= control target key start
LH: loop header
LB: loop body
LE: loop exit
PB: predicated region body
PF: predicated region fallthrough
CT: control target
= control target key end

     0   :  { %8 = vsyncpa [#allocation3], 0  ;;  %s226_s0 = inlined_call_operand.hbm [shape: f32[8,32], index: 0, kind: input, shape index: {}]   ;;  %s227_s1 = inlined_call_operand.hbm [shape: f32[32,128], index: 1, kind: input, shape index: {}]   ;;  %s228_s2 = inlined_call_operand.vmem [shape: f32[1,128], index: 2, kind: input, shape index: {}]   ;;  %s229_s3 = inlined_call_operand.hbm [shape: f32[8,128], index: 3, kind: output, shape index: {}]  }
   0x1   :  { %9 = vsyncpa [#allocation6], 0 }
   0x2   :  { %10 = vsyncpa [#allocation4], 0  ;;  %s16_s14 = sshll.u32 %s226_s0, 4  ;;  %s189_s15 = smov [#allocation2]   ;;  %s17_s14 = int_to_ptr.hbm [resolvable:$true] %s16_s14 }
   0x3   :  { %s18_s16 = sshll.u32 %s189_s15, 4  ;;  %s26_s19 = sshll.u32 %s227_s1, 4  ;;  %s19_s16 = int_to_ptr.vmem [resolvable:$true] %s18_s16  ;;  %s27_s19 = int_to_ptr.hbm [resolvable:$true] %s26_s19 }
   0x4   :  { %21 = dma.hbm_to_vmem [thread:$0]  %s17_s14, 128, %s19_s16, [#allocation3]  }
   0x5   :  { %s190_s20 = smov [#allocation5]   ;;  %s191_s22 = smov 128  }
   0x6   :  { %s28_s21 = sshll.u32 %s190_s20, 4  ;;  %s192_s23 = smov 8   ;;  %s29_s21 = int_to_ptr.vmem [resolvable:$true] %s28_s21 }
   0x7   :  { %34 = dma.hbm_to_vmem [thread:$0]  %s27_s19, 512, %s29_s21, [#allocation6], %s191_s22, %s191_s22, %s192_s23  }
   0x8   :  { %183 = dma.done.wait [#allocation3], 128  }
   0x9   :  { %184 = vsyncadd [#allocation3], 4294967168 }
   0xa   :  { %185 = dma.done.wait [#allocation6], 512  }
   0xb   :  { %186 = vsyncadd [#allocation6], 4294966784  ;;  %v59_v0 = vld [vmem:[#allocation5 + $0x18] sm:$0xff]  ;;  %v58_v1 = vld [vmem:[#allocation5 + $0x10] sm:$0xff]  ;;  %vm60_vm0 = vcmask 261120   ;;  %s193_s24 = smov [#allocation7]  }
   0xc   :  { %76 = vmatpush.msra.mxu0 %v59_v0  ;;  %v57_v2 = vld [vmem:[#allocation5 + $0x8] sm:$0xff]  ;;  %v56_v3 = vld [vmem:[#allocation5] sm:$0xff]  ;;  %v55_v4 = vld [vmem:[#allocation2] sm:$0xff]  ;;  %s91_s25 = sshll.u32 %s193_s24, 4  ;;  %s93_s28 = sshll.u32 %s229_s3, 4  ;;  %s92_s25 = int_to_ptr.vmem [resolvable:$true] %s91_s25  ;;  %s94_s28 = int_to_ptr.hbm [resolvable:$true] %s93_s28 }
   0xd   :  { %v110_v5 = vld [vmem:[%s228_s2] ss:$0 sm:$0xff] }
   0xe   :  { %77 = vmatpush.msra.mxu0 %v58_v1 }
  0x10   :  { %78 = vmatpush.msra.mxu0 %v57_v2 }
  0x12   :  { %79 = vmatpush.msra.mxu0 %v56_v3 }
  0x13   :  { %104 = vmatmul.msk.f32.vlgmr.msra.gmra.mxu0 %vm60_vm0, %v55_v4 }
  0x90   :  { %v81_v6 = vpop.f32.mrf.mxu0 }
  0x91   :  { %v84_v7 = vadd.f32 %v110_v5, %v81_v6 }
  0x93   :  { %85 = vst [vmem:[#allocation7] sm:$0xff] %v84_v7 }
  0x94   :  { %96 = dma.vmem_to_hbm [thread:$0]  %s92_s25, 128, %s94_s28, [#allocation4]  }
  0x95   :  { %187 = dma.done.wait [#allocation4], 128  }
  0x96   :  { %188 = vsyncadd [#allocation4], 4294967168 }
  0x97   :  { %101 = vsyncpa [#allocation3], 1 }
  0x98   :  { %102 = vsyncpa [#allocation6], 1 }
  0x99   :  { %103 = vsyncpa [#allocation4], 1 }

</bundles_post_ra>
